<compile_context>
chip_gen: v5e
topology: v5e:2x2
jax: 0.10.0
libtpu: 0.0.40
codegen_flags: <defaults>
</compile_context>

<pallas_src>
from functools import partial

import jax
import jax.numpy as jnp
import numpy as np
from jax.experimental import pallas as pl
from jax.experimental.pallas import tpu as pltpu

# ---- synthetic module hyper-parameters (small, consistent with the PyTorch module) ----
VOCAB_SIZE = 16                                   # char vocab size
CHAR_EMBED_DIM = 16                               # embed_dim == conv in-channels
CHAR_FEATURE_SIZE = 16                            # conv out-channels
CONV_FILTER_SIZE = 3                              # Conv1d kernel width
MAX_WORD_LEN = 8
POOL_K = MAX_WORD_LEN + CONV_FILTER_SIZE - 1      # MaxPool1d kernel == stride == 10
POOL_PAD = ((POOL_K + 7) // 8) * 8                # pool window padded to 16 sublane rows
BATCH = 2
NUM_WORDS = 4
CHAR_SEQ_LEN = NUM_WORDS * POOL_K + CONV_FILTER_SIZE - 1   # 42 chars per sample
CONV_OUT_LEN = CHAR_SEQ_LEN - CONV_FILTER_SIZE + 1         # 40
POOL_OUT_LEN = CONV_OUT_LEN // POOL_K                      # 4 (MaxPool1d floor semantics)


def char_embeddings_kernel(idx_ref, wf_ref, bias_ref, out_ref, *, pool_k, pool_pad):
    """One tile of pool windows.

    idx_ref  : (TW*KP, KW) int32 -- row r = (window w, in-window row p); column k holds the
               char id for conv tap k.  Pad rows (p >= pool_k) hold 0 and are masked below.
    wf_ref   : (KW, V, F)  f32   -- fused table: wf[k, v, :] = emb[v, :] @ W_k
                                     (embedding folded into the conv weights; row v=0 is 0
                                      which reproduces padding_idx=0)
    bias_ref : (1, F)      f32   -- conv bias
    out_ref  : (TW, F)     f32   -- tanh(maxpool(conv(embed(chars)))) for this window tile
    """
    R, KW = idx_ref.shape
    V = wf_ref.shape[1]
    F = wf_ref.shape[2]
    KP = pool_pad
    TW = R // KP

    # TODO(synk): nn.Dropout implemented as inference-mode identity (no PRNG mask).

    # --- nn.Embedding + Conv1d fused: per-tap one-hot built in-kernel against a lane
    #     iota, then KW small MXU matmuls summed (no inflated one-hot operand on HBM). ---
    vocab = jax.lax.broadcasted_iota(jnp.int32, (R, V), 1)          # lane id -> vocab id
    idx_all = idx_ref[...]                                          # (R, KW)
    acc = None
    for k in range(KW):                                             # KW small & static
        onehot_k = (idx_all[:, k:k + 1] == vocab).astype(jnp.float32)          # (R, V)
        part = jnp.dot(onehot_k, wf_ref[k], preferred_element_type=jnp.float32)
        acc = part if acc is None else acc + part                               # (R, F)

    # --- MaxPool1d(K, K): mask the pad rows to -inf ONCE, then one segmented max
    #     per padded window (reshape + reduce; no per-window where/concat loop). ---
    row_in_win = jax.lax.broadcasted_iota(jnp.int32, (R, F), 0) % KP
    acc = jnp.where(row_in_win < pool_k, acc, -jnp.inf)
    pooled = acc.reshape(TW, KP, F).max(axis=1)                                  # (TW, F)

    # --- conv bias AFTER the max (exact for a per-channel constant), then tanh ---
    out_ref[...] = jnp.tanh(pooled + bias_ref[...])


def fuse_char_weights(emb_table, conv_w, conv_b):
    """Weights-only precompute (run once per model, not per forward).

    Folds nn.Embedding into the Conv1d taps:  wf[k, v, :] = emb[v, :] @ W_k  (exact).
    emb_table: (V, E); conv_w: (F, E, KW) [PyTorch layout]; conv_b: (F,).
    """
    wt = jnp.transpose(conv_w, (2, 1, 0)).astype(jnp.float32)                   # (KW, E, F)
    wf = jnp.einsum('ve,kef->kvf', emb_table.astype(jnp.float32), wt,
                    precision=jax.lax.Precision.HIGHEST)                        # (KW, V, F)
    bias = conv_b.reshape(1, -1).astype(jnp.float32)                            # (1, F)
    return wf, bias


def _pick_tile_w(num_windows):
    # 64 windows * 16 padded rows = 1024 sublane rows per grid step at scale;
    # single step (whole batch) at toy sizes.
    for cand in (64, 32, 16, 8):
        if num_windows > cand and num_windows % cand == 0:
            return cand
    return num_windows


@jax.jit
def char_embeddings_forward(char_seq, wf, bias):
    """char_seq: (B, L) int; wf: (KW, V, F) fused table; bias: (1, F)."""
    B, L = char_seq.shape
    KW, V, F = wf.shape
    K, KP = POOL_K, POOL_PAD
    T = (L - KW + 1) // K                        # words per sample (MaxPool1d floor)
    W = B * T                                    # total pool windows
    R = W * KP                                   # padded im2col rows fed to the kernel

    # ---- compact im2col of the char ids (layout plumbing; fuses under this jit) ----
    # row r = (b, t, p) -> column k holds char_seq[b, t*K + p + k]; windows padded K -> KP.
    idx = char_seq.astype(jnp.int32)
    taps = jnp.stack([idx[:, k:k + T * K] for k in range(KW)], axis=-1)         # (B, T*K, KW)
    taps = taps.reshape(B, T, K, KW)
    taps = jnp.pad(taps, ((0, 0), (0, 0), (0, KP - K), (0, 0)))                 # (B, T, KP, KW)
    idx_rows = taps.reshape(R, KW)                                              # (R, KW) compact

    tile_w = _pick_tile_w(W)
    grid = (W // tile_w,)

    out = pl.pallas_call(
        partial(char_embeddings_kernel, pool_k=K, pool_pad=KP),
        out_shape=jax.ShapeDtypeStruct((W, F), jnp.float32),
        grid_spec=pltpu.PrefetchScalarGridSpec(
            num_scalar_prefetch=0,
            grid=grid,                                   # tiled over pool-window rows
            in_specs=[
                pl.BlockSpec((tile_w * KP, KW), lambda i: (i, 0)),
                pl.BlockSpec((KW, V, F), lambda i: (0, 0, 0)),
                pl.BlockSpec((1, F), lambda i: (0, 0)),
            ],
            out_specs=pl.BlockSpec((tile_w, F), lambda i: (i, 0)),
        ),
        compiler_params=pltpu.CompilerParams(
            dimension_semantics=("parallel",)),          # independent window tiles
    )(idx_rows, wf, bias)

    return out.reshape(B, T, F)


if __name__ == "__main__":
    key = jax.random.PRNGKey(0)
    k1, k2, k3, k4 = jax.random.split(key, 4)

    # deterministic synthetic parameters (shapes from the module __init__)
    emb = 0.1 * jax.random.normal(k1, (VOCAB_SIZE, CHAR_EMBED_DIM), jnp.float32)
    emb = emb.at[0].set(0.0)  # padding_idx=0
    conv_w = 0.1 * jax.random.normal(
        k2, (CHAR_FEATURE_SIZE, CHAR_EMBED_DIM, CONV_FILTER_SIZE), jnp.float32)
    conv_b = 0.1 * jax.random.normal(k3, (CHAR_FEATURE_SIZE,), jnp.float32)
    char_seq = jax.random.randint(k4, (BATCH, CHAR_SEQ_LEN), 0, VOCAB_SIZE, jnp.int32)

    wf, bias = fuse_char_weights(emb, conv_w, conv_b)    # weights-only, hoisted out of forward
    out = char_embeddings_forward(char_seq, wf, bias)
    out = jax.block_until_ready(out)
    assert out.shape == (BATCH, POOL_OUT_LEN, CHAR_FEATURE_SIZE)

    # plain-JAX reference (mirrors the PyTorch forward, eval-mode dropout)
    x = emb[char_seq]                         # (B, L, E)  embedding lookup
    x = jnp.transpose(x, (0, 2, 1))           # (B, E, L)  NCW like PyTorch conv1d input
    conv = jnp.zeros((BATCH, CHAR_FEATURE_SIZE, CONV_OUT_LEN), jnp.float32) \
        + conv_b[None, :, None]
    for k in range(CONV_FILTER_SIZE):
        conv = conv + jnp.einsum('bel,fe->bfl',
                                 x[:, :, k:k + CONV_OUT_LEN], conv_w[:, :, k],
                                 precision=jax.lax.Precision.HIGHEST)
    pooled = conv.reshape(BATCH, CHAR_FEATURE_SIZE, POOL_OUT_LEN, POOL_K).max(-1)
    ref = jnp.transpose(jnp.tanh(pooled), (0, 2, 1))   # (B, T, F)
    np.testing.assert_allclose(np.asarray(out), np.asarray(ref), rtol=1e-5, atol=1e-5)

    print("KERNEL_OK")
</pallas_src>

<mosaic_0001>
module attributes {stable_mosaic.version = 11 : i64} {
  func.func @char_embeddings_kernel(%arg0: i32, %arg1: memref<128x3xi32, #tpu.memory_space<vmem>>, %arg2: memref<3x16x16xf32, #tpu.memory_space<vmem>>, %arg3: memref<1x16xf32, #tpu.memory_space<vmem>>, %arg4: memref<8x16xf32, #tpu.memory_space<vmem>>) attributes {dimension_semantics = [#tpu.dimension_semantics<parallel>], iteration_bounds = array<i64: 1>, scalar_prefetch = 0 : i64, scratch_operands = 0 : i64, tpu.core_type = #tpu.core_type<tc>, window_params = [{transform_indices = @transform_0, window_bounds = array<i64: 128, 3>}, {pipeline_mode = #tpu.pipeline_mode<synchronous>, transform_indices = @transform_1, window_bounds = array<i64: 3, 16, 16>}, {pipeline_mode = #tpu.pipeline_mode<synchronous>, transform_indices = @transform_2, window_bounds = array<i64: 1, 16>}, {transform_indices = @transform_3, window_bounds = array<i64: 8, 16>}]} {
    %0 = tpu.iota {dimensions = array<i32: 1>} : vector<128x16xi32>
    %c0 = arith.constant 0 : index
    %c0_0 = arith.constant 0 : index
    %1 = vector.load %arg1[%c0, %c0_0] : memref<128x3xi32, #tpu.memory_space<vmem>>, vector<128x3xi32>
    %2 = vector.extract_strided_slice %1 {offsets = [0, 0], sizes = [128, 1], strides = [1, 1]} : vector<128x3xi32> to vector<128x1xi32>
    %3 = vector.broadcast %2 : vector<128x1xi32> to vector<128x16xi32>
    %4 = arith.cmpi eq, %3, %0 : vector<128x16xi32>
    %5 = arith.extui %4 : vector<128x16xi1> to vector<128x16xi32>
    %6 = arith.sitofp %5 : vector<128x16xi32> to vector<128x16xf32>
    %c0_1 = arith.constant 0 : index
    %c0_2 = arith.constant 0 : index
    %c0_3 = arith.constant 0 : index
    %7 = vector.load %arg2[%c0_1, %c0_2, %c0_3] : memref<3x16x16xf32, #tpu.memory_space<vmem>>, vector<1x16x16xf32>
    %8 = vector.shape_cast %7 : vector<1x16x16xf32> to vector<16x16xf32>
    %cst = arith.constant dense<0.000000e+00> : vector<128x16xf32>
    %9 = tpu.matmul %6, %8, %cst {dimension_numbers = #tpu.dot_dimension_numbers<[1], [0], [0], [1], [0, 0, 1, 1], [], []>} : vector<128x16xf32>, vector<16x16xf32>, vector<128x16xf32> -> vector<128x16xf32>
    %10 = vector.extract_strided_slice %1 {offsets = [0, 1], sizes = [128, 1], strides = [1, 1]} : vector<128x3xi32> to vector<128x1xi32>
    %11 = vector.broadcast %10 : vector<128x1xi32> to vector<128x16xi32>
    %12 = arith.cmpi eq, %11, %0 : vector<128x16xi32>
    %13 = arith.extui %12 : vector<128x16xi1> to vector<128x16xi32>
    %14 = arith.sitofp %13 : vector<128x16xi32> to vector<128x16xf32>
    %c1 = arith.constant 1 : index
    %c0_4 = arith.constant 0 : index
    %c0_5 = arith.constant 0 : index
    %15 = vector.load %arg2[%c1, %c0_4, %c0_5] : memref<3x16x16xf32, #tpu.memory_space<vmem>>, vector<1x16x16xf32>
    %16 = vector.shape_cast %15 : vector<1x16x16xf32> to vector<16x16xf32>
    %cst_6 = arith.constant dense<0.000000e+00> : vector<128x16xf32>
    %17 = tpu.matmul %14, %16, %cst_6 {dimension_numbers = #tpu.dot_dimension_numbers<[1], [0], [0], [1], [0, 0, 1, 1], [], []>} : vector<128x16xf32>, vector<16x16xf32>, vector<128x16xf32> -> vector<128x16xf32>
    %18 = arith.addf %9, %17 : vector<128x16xf32>
    %19 = vector.extract_strided_slice %1 {offsets = [0, 2], sizes = [128, 1], strides = [1, 1]} : vector<128x3xi32> to vector<128x1xi32>
    %20 = vector.broadcast %19 : vector<128x1xi32> to vector<128x16xi32>
    %21 = arith.cmpi eq, %20, %0 : vector<128x16xi32>
    %22 = arith.extui %21 : vector<128x16xi1> to vector<128x16xi32>
    %23 = arith.sitofp %22 : vector<128x16xi32> to vector<128x16xf32>
    %c2 = arith.constant 2 : index
    %c0_7 = arith.constant 0 : index
    %c0_8 = arith.constant 0 : index
    %24 = vector.load %arg2[%c2, %c0_7, %c0_8] : memref<3x16x16xf32, #tpu.memory_space<vmem>>, vector<1x16x16xf32>
    %25 = vector.shape_cast %24 : vector<1x16x16xf32> to vector<16x16xf32>
    %cst_9 = arith.constant dense<0.000000e+00> : vector<128x16xf32>
    %26 = tpu.matmul %23, %25, %cst_9 {dimension_numbers = #tpu.dot_dimension_numbers<[1], [0], [0], [1], [0, 0, 1, 1], [], []>} : vector<128x16xf32>, vector<16x16xf32>, vector<128x16xf32> -> vector<128x16xf32>
    %27 = arith.addf %18, %26 : vector<128x16xf32>
    %28 = tpu.iota {dimensions = array<i32: 0>} : vector<128x16xi32>
    %c16_i32 = arith.constant 16 : i32
    %c0_i32 = arith.constant 0 : i32
    %29 = arith.cmpi eq, %c16_i32, %c0_i32 : i32
    %c1_i32 = arith.constant 1 : i32
    %30 = arith.select %29, %c1_i32, %c16_i32 : i32
    %31 = vector.broadcast %30 : i32 to vector<128x16xi32>
    %32 = arith.remsi %28, %31 : vector<128x16xi32>
    %c0_i32_10 = arith.constant 0 : i32
    %33 = vector.broadcast %c0_i32_10 : i32 to vector<128x16xi32>
    %34 = arith.cmpi ne, %32, %33 : vector<128x16xi32>
    %c0_i32_11 = arith.constant 0 : i32
    %35 = vector.broadcast %c0_i32_11 : i32 to vector<128x16xi32>
    %36 = arith.cmpi slt, %32, %35 : vector<128x16xi32>
    %c0_i32_12 = arith.constant 0 : i32
    %37 = arith.cmpi slt, %30, %c0_i32_12 : i32
    %38 = vector.broadcast %37 : i1 to vector<128x16xi1>
    %39 = vector.broadcast %38 : vector<128x16xi1> to vector<128x16xi1>
    %40 = arith.xori %36, %39 : vector<128x16xi1>
    %41 = arith.andi %40, %34 : vector<128x16xi1>
    %42 = vector.broadcast %30 : i32 to vector<128x16xi32>
    %43 = arith.addi %32, %42 : vector<128x16xi32>
    %44 = arith.select %41, %43, %32 : vector<128x16xi1>, vector<128x16xi32>
    %c10_i32 = arith.constant 10 : i32
    %45 = vector.broadcast %c10_i32 : i32 to vector<128x16xi32>
    %46 = arith.cmpi slt, %44, %45 : vector<128x16xi32>
    %cst_13 = arith.constant 0xFF800000 : f32
    %47 = vector.broadcast %cst_13 : f32 to vector<128x16xf32>
    %48 = arith.select %46, %27, %47 : vector<128x16xi1>, vector<128x16xf32>
    %49 = vector.shape_cast %48 : vector<128x16xf32> to vector<8x16x16xf32>
    %cst_14 = arith.constant dense<0xFF800000> : vector<8x16xf32>
    %50 = vector.multi_reduction <maximumf>, %49, %cst_14 [1] : vector<8x16x16xf32> to vector<8x16xf32>
    %c0_15 = arith.constant 0 : index
    %c0_16 = arith.constant 0 : index
    %51 = vector.load %arg3[%c0_15, %c0_16] : memref<1x16xf32, #tpu.memory_space<vmem>>, vector<1x16xf32>
    %52 = vector.broadcast %51 : vector<1x16xf32> to vector<8x16xf32>
    %53 = arith.addf %50, %52 : vector<8x16xf32>
    %54 = math.tanh %53 : vector<8x16xf32>
    %c0_17 = arith.constant 0 : index
    %c0_18 = arith.constant 0 : index
    %55 = vector.load %arg4[%c0_17, %c0_18] : memref<8x16xf32, #tpu.memory_space<vmem>>, vector<8x16xf32>
    tpu.vector_store %arg4[%c0_17, %c0_18], %54 {strides = array<i32>} : memref<8x16xf32, #tpu.memory_space<vmem>>, vector<8x16xf32>,
    return
  }
  func.func @transform_0(%arg0: i32) -> (i32, i32) {
    %c0_i32 = arith.constant 0 : i32
    %c0_i32_0 = arith.constant 0 : i32
    return %arg0, %c0_i32 : i32, i32
  }
  func.func @transform_1(%arg0: i32) -> (i32, i32, i32) {
    %c0_i32 = arith.constant 0 : i32
    %c0_i32_0 = arith.constant 0 : i32
    %c0_i32_1 = arith.constant 0 : i32
    %c0_i32_2 = arith.constant 0 : i32
    return %c0_i32, %c0_i32_0, %c0_i32_1 : i32, i32, i32
  }
  func.func @transform_2(%arg0: i32) -> (i32, i32) {
    %c0_i32 = arith.constant 0 : i32
    %c0_i32_0 = arith.constant 0 : i32
    %c0_i32_1 = arith.constant 0 : i32
    return %c0_i32, %c0_i32_0 : i32, i32
  }
  func.func @transform_3(%arg0: i32) -> (i32, i32) {
    %c0_i32 = arith.constant 0 : i32
    %c0_i32_0 = arith.constant 0 : i32
    return %arg0, %c0_i32 : i32, i32
  }
}

</mosaic_0001>

<bundles_post_ra>
// kernel: char_embeddings_forward.1
= control target key start
LH: loop header
LB: loop body
LE: loop exit
PB: predicated region body
PF: predicated region fallthrough
CT: control target
= control target key end

     0   :  { %v1258_v2 = vmov 1   ;;  %v1259_v3 = vmov 0   ;;  %s1628_s0 = inlined_call_operand.vmem [shape: s32[128,3], index: 0, kind: input, shape index: {}]   ;;  %s1629_s1 = inlined_call_operand.vmem [shape: f32[3,16,16], index: 1, kind: input, shape index: {}]   ;;  %s1630_s2 = inlined_call_operand.vmem [shape: f32[1,16], index: 2, kind: input, shape index: {}]   ;;  %s1631_s3 = inlined_call_operand.hbm [shape: f32[8,16], index: 3, kind: output, shape index: {}]  }
   0x1   :  { %v29_v0 = vld [vmem:[%s1628_s0 + $0x60] sm:$0xff]  ;;  %1176 = vset.pattern.permute.xlu0 %v1258_v2  ;;  %1178 = vset.pattern.permute.xlu1 %v1259_v3 }
   0x2   :  { %v17_v1 = vld [vmem:[%s1628_s0] sm:$0xff]  ;;  %168 = vperm.xlu0 %1176, %v29_v0  }
   0x3   :  { %34 = vperm.xlu1 %1178, %v17_v1  }
   0x4   :  { %8 = vsyncpa [#allocation3], 0  ;;  %v18_v4 = vld [vmem:[%s1628_s0 + $0x8] sm:$0xff]  ;;  %v1260_v5 = vmov 2   ;;  %v19_v7 = vld [vmem:[%s1628_s0 + $0x10] sm:$0xff]  ;;  %v15_v24 = vlaneseq  ;;  %vm230_vm0 = vcmask 130048  }
   0x5   :  { %1180 = vset.pattern.permute.xlu2 %v1260_v5  ;;  %v1300_v6 = vld [vmem:[%s1628_s0 + $0x68] sm:$0xff]  ;;  %v21_v8 = vld [vmem:[%s1628_s0 + $0x20] sm:$0xff]  ;;  %v1314_v9 = vld [vmem:[%s1628_s0 + $0x70] sm:$0xff]  ;;  %v1261_v30 = vmov 0.0   ;;  %s1056_s5 = sshll.u32 %s1631_s3, 4  ;;  %s1057_s5 = int_to_ptr.hbm [resolvable:$true] %s1056_s5 }
   0x6   :  { %461 = vperm.xlu2 %1180, %v18_v4   ;;  %v1323_v10 = vld [vmem:[%s1628_s0 + $0x78] sm:$0xff]  ;;  %v22_v12 = vld [vmem:[%s1628_s0 + $0x28] sm:$0xff]  ;;  %v23_v15 = vld [vmem:[%s1628_s0 + $0x30] sm:$0xff]  ;;  %v1391_v27 = vand.u32 127, %v15_v24 }
   0x7   :  { %v20_v11 = vld [vmem:[%s1628_s0 + $0x18] sm:$0xff]  ;;  %v130_v14 = vld [vmem:[%s1629_s1 + $0x8] sm:$0xff]  ;;  %v129_v17 = vld [vmem:[%s1629_s1] sm:$0xff] }
   0x8   :  { %v24_v13 = vld [vmem:[%s1628_s0 + $0x38] sm:$0xff]  ;;  %406 = vmatpush.msra.mxu1 %v130_v14  ;;  %v1358_v16 = vld [vmem:[%s1628_s0 + $0x48] sm:$0xff]  ;;  %v1097_v21 = vld [vmem:[%s1629_s1 + $0x10] sm:$0xff] }
   0x9   :  { %v1098_v18 = vld [vmem:[%s1629_s1 + $0x18] sm:$0xff]  ;;  %v1148_v19 = vld [vmem:[%s1629_s1 + $0x28] sm:$0xff]  ;;  %v1147_v22 = vld [vmem:[%s1629_s1 + $0x20] sm:$0xff] }
   0xa   :  { %1177 = vset.pattern.permute.xlu0 %v1260_v5  ;;  %407 = vmatpush.msra.mxu1 %v129_v17  ;;  %v25_v25 = vld [vmem:[%s1628_s0 + $0x40] sm:$0xff]  ;;  %v1405_v34 = vld [vmem:[%s1628_s0 + $0x58] sm:$0xff]  ;;  %v27_v41 = vld [vmem:[%s1628_s0 + $0x50] sm:$0xff] }
   0xb   :  { %1179 = vset.pattern.permute.xlu1 %v1258_v2  ;;  %458 = vperm.xlu0 %1177, %v17_v1  }
   0xc   :  { %132 = vperm.xlu1 %1179, %v17_v1   ;;  %293 = vmatpush.msra.mxu0 %v1098_v18 }
   0xd   :  { %1165 = vmatpush.msra.mxu3 %v1098_v18  ;;  %618 = vmatpush.msra.mxu2 %v1148_v19 }
   0xe   :  { %1181 = vset.pattern.permute.xlu2 %v1258_v2  ;;  %294 = vmatpush.msra.mxu0 %v1097_v21 }
   0xf   :  { %171 = vperm.xlu2 %1181, %v1300_v6   ;;  %1166 = vmatpush.msra.mxu3 %v1097_v21 }
  0x10   :  { %619 = vmatpush.msra.mxu2 %v1147_v22 }
  0x11   :  { %1167 = vmatpush.msrb.mxu3 %v130_v14 }
  0x13   :  { %464 = vperm.xlu0 %1177, %v19_v7   ;;  %1168 = vmatpush.msrb.mxu3 %v129_v17 }
  0x14   :  { %1182 = vset.pattern.permute.xlu1 %v1259_v3 }
  0x15   :  { %37 = vperm.xlu1 %1182, %v18_v4  }
  0x17   :  { %135 = vperm.xlu2 %1181, %v18_v4  }
  0x1b   :  { %1190 = vset.pattern.permute.xlu0 %v1259_v3 }
  0x1c   :  { %46 = vperm.xlu0 %1190, %v21_v8  }
  0x1d   :  { %1183 = vset.pattern.permute.xlu1 %v1258_v2 }
  0x1e   :  { %174 = vperm.xlu1 %1183, %v1314_v9  }
  0x1f   :  { %1184 = vset.pattern.permute.xlu2 %v1259_v3 }
  0x20   :  { %40 = vperm.xlu2 %1184, %v19_v7  }
  0x24   :  { %1191 = vset.pattern.permute.xlu0 %v1258_v2 }
  0x25   :  { %177 = vperm.xlu0 %1191, %v1323_v10  }
  0x26   :  { %138 = vperm.xlu1 %1183, %v19_v7  }
  0x28   :  { %1185 = vset.pattern.permute.xlu2 %v1260_v5 }
  0x29   :  { %467 = vperm.xlu2 %1185, %v20_v11  }
  0x2d   :  { %147 = vperm.xlu0 %1191, %v22_v12  }
  0x2e   :  { %1186 = vset.pattern.permute.xlu1 %v1259_v3 }
  0x2f   :  { %43 = vperm.xlu1 %1186, %v20_v11  }
  0x31   :  { %1187 = vset.pattern.permute.xlu2 %v1258_v2 }
  0x32   :  { %141 = vperm.xlu2 %1187, %v20_v11  }
  0x35   :  { %1199 = vset.pattern.permute.xlu0 %v1260_v5 }
  0x36   :  { %479 = vperm.xlu0 %1199, %v24_v13  }
  0x37   :  { %1188 = vset.pattern.permute.xlu1 %v1260_v5 }
  0x38   :  { %470 = vperm.xlu1 %1188, %v21_v8  }
  0x3a   :  { %1189 = vset.pattern.permute.xlu2 %v1259_v3 }
  0x3b   :  { %70 = vperm.xlu2 %1189, %v29_v0  }
  0x3e   :  { %494 = vperm.xlu0 %1199, %v29_v0  }
  0x40   :  { %1192 = vset.pattern.permute.xlu1 %v1258_v2 }
  0x41   :  { %144 = vperm.xlu1 %1192, %v21_v8  }
  0x43   :  { %1193 = vset.pattern.permute.xlu2 %v1260_v5 }
  0x44   :  { %473 = vperm.xlu2 %1193, %v22_v12  }
  0x46   :  { %485 = vperm.xlu0 %1199, %v1358_v16  }
  0x49   :  { %1194 = vset.pattern.permute.xlu1 %v1259_v3 }
  0x4a   :  { %73 = vperm.xlu1 %1194, %v1300_v6  }
  0x4c   :  { %1195 = vset.pattern.permute.xlu2 %v1259_v3 }
  0x4d   :  { %49 = vperm.xlu2 %1195, %v22_v12  }
  0x4e   :  { %1207 = vset.pattern.permute.xlu0 %v1258_v2 }
  0x4f   :  { %159 = vperm.xlu0 %1207, %v1358_v16  }
  0x52   :  { %1196 = vset.pattern.permute.xlu1 %v1260_v5 }
  0x53   :  { %476 = vperm.xlu1 %1196, %v23_v15  }
  0x55   :  { %76 = vperm.xlu2 %1195, %v1314_v9  }
  0x57   :  { %1211 = vset.pattern.permute.xlu0 %v1260_v5 }
  0x58   :  { %491 = vperm.xlu0 %1211, %v1405_v34  }
  0x5b   :  { %1197 = vset.pattern.permute.xlu1 %v1259_v3 }
  0x5c   :  { %52 = vperm.xlu1 %1197, %v23_v15  }
  0x5d   :  { %1198 = vset.pattern.permute.xlu2 %v1258_v2 }
  0x5e   :  { %150 = vperm.xlu2 %1198, %v23_v15  }
  0x60   :  { %v1374_v20 = vpop.permute.xlu2 %461 }
  0x61   :  { %vm506_vm7 = vcmp.eq.s32.totalorder %v1374_v20, %v1391_v27 }
  0x62   :  { %v1132_v45 = vsel %vm506_vm7, 1.0, %v1261_v30 }
  0x64   :  { %79 = vperm.xlu1 %1197, %v1323_v10  }
  0x66   :  { %1200 = vset.pattern.permute.xlu2 %v1259_v3 }
  0x67   :  { %55 = vperm.xlu2 %1200, %v24_v13  }
  0x69   :  { %v172_v23 = vpop.permute.xlu2 %171 }
  0x6a   :  { %vm192_vm3 = vcmp.eq.s32.totalorder %v172_v23, %v1391_v27 }
  0x6b   :  { %v1094_v35 = vsel %vm192_vm3, 1.0, %v1261_v30 }
  0x6c   :  { %1201 = vset.pattern.permute.xlu1 %v1258_v2 }
  0x6d   :  { %153 = vperm.xlu1 %1201, %v24_v13  }
  0x6f   :  { %1202 = vset.pattern.permute.xlu2 %v1260_v5 }
  0x70   :  { %482 = vperm.xlu2 %1202, %v25_v25  }
  0x71   :  { %v136_v26 = vpop.permute.xlu2 %135 }
  0x72   :  { %vm180_vm6 = vcmp.eq.s32.totalorder %v136_v26, %v1391_v27 }
  0x73   :  { %v1082_v42 = vsel %vm180_vm6, 1.0, %v1261_v30 }
  0x74   :  { %v169_v29 = vpop.permute.xlu0 %168 }
  0x75   :  { %1203 = vset.pattern.permute.xlu1 %v1259_v3  ;;  %v35_v28 = vpop.permute.xlu1 %34  ;;  %vm191_vm2 = vcmp.eq.s32.totalorder %v169_v29, %v1391_v27 }
  0x76   :  { %vm81_vm1 = vcmp.eq.s32.totalorder %v35_v28, %v1391_v27  ;;  %58 = vperm.xlu1 %1203, %v25_v25   ;;  %v1093_v32 = vsel %vm191_vm2, 1.0, %v1261_v30 }
  0x77   :  { %v1065_v31 = vsel %vm81_vm1, 1.0, %v1261_v30  ;;  %1111 = vmatmul.msk.f32.vlgmr.msra.gmra.mxu3 %vm230_vm0, %v1093_v32 }
  0x78   :  { %1204 = vset.pattern.permute.xlu2 %v1258_v2  ;;  %1115 = vmatmul.msk.f32.vlgmr.msra.gmra.mxu1 %vm230_vm0, %v1065_v31 }
  0x79   :  { %156 = vperm.xlu2 %1204, %v25_v25   ;;  %1169 = vmatpush.msra.mxu3 %v1148_v19 }
  0x7a   :  { %v41_v33 = vpop.permute.xlu2 %40 }
  0x7b   :  { %1170 = vmatpush.msra.mxu3 %v1147_v22  ;;  %vm83_vm10 = vcmp.eq.s32.totalorder %v41_v33, %v1391_v27 }
  0x7c   :  { %v1067_v49 = vsel %vm83_vm10, 1.0, %v1261_v30 }
  0x7d   :  { %v459_v37 = vpop.permute.xlu0 %458 }
  0x7e   :  { %1205 = vset.pattern.permute.xlu1 %v1260_v5  ;;  %v133_v36 = vpop.permute.xlu1 %132  ;;  %vm505_vm5 = vcmp.eq.s32.totalorder %v459_v37, %v1391_v27 }
  0x7f   :  { %vm179_vm4 = vcmp.eq.s32.totalorder %v133_v36, %v1391_v27  ;;  %497 = vperm.xlu1 %1205, %v1300_v6   ;;  %v1131_v39 = vsel %vm505_vm5, 1.0, %v1261_v30  ;;  %1112 = vmatmul.msk.f32.gmra.mxu3 %vm230_vm0, %v1094_v35 }
  0x80   :  { %v1081_v38 = vsel %vm179_vm4, 1.0, %v1261_v30  ;;  %1149 = vmatmul.msk.f32.vlgmr.msra.gmra.mxu2 %vm230_vm0, %v1131_v39 }
  0x81   :  { %1099 = vmatmul.msk.f32.vlgmr.msra.gmra.mxu0 %vm230_vm0, %v1081_v38  ;;  %1206 = vset.pattern.permute.xlu2 %v1259_v3 }
  0x82   :  { %61 = vperm.xlu2 %1206, %v1358_v16  }
  0x83   :  { %v468_v40 = vpop.permute.xlu2 %467 }
  0x84   :  { %vm508_vm12 = vcmp.eq.s32.totalorder %v468_v40, %v1391_v27 }
  0x85   :  { %v465_v44 = vpop.permute.xlu0 %464  ;;  %v1134_v54 = vsel %vm508_vm12, 1.0, %v1261_v30 }
  0x86   :  { %vm507_vm9 = vcmp.eq.s32.totalorder %v465_v44, %v1391_v27 }
  0x87   :  { %488 = vperm.xlu1 %1205, %v27_v41   ;;  %v38_v43 = vpop.permute.xlu1 %37  ;;  %v1133_v48 = vsel %vm507_vm9, 1.0, %v1261_v30 }
  0x88   :  { %vm82_vm8 = vcmp.eq.s32.totalorder %v38_v43, %v1391_v27  ;;  %1150 = vmatmul.msk.f32.gmra.mxu2 %vm230_vm0, %v1132_v45 }
  0x89   :  { %v1066_v46 = vsel %vm82_vm8, 1.0, %v1261_v30  ;;  %1100 = vmatmul.msk.f32.gmra.mxu0 %vm230_vm0, %v1082_v42 }
  0x8a   :  { %1116 = vmatmul.msk.f32.gmra.mxu1 %vm230_vm0, %v1066_v46  ;;  %1208 = vset.pattern.permute.xlu2 %v1260_v5 }
  0x8b   :  { %500 = vperm.xlu2 %1208, %v1314_v9  }
  0x8c   :  { %v142_v47 = vpop.permute.xlu2 %141 }
  0x8d   :  { %vm182_vm15 = vcmp.eq.s32.totalorder %v142_v47, %v1391_v27 }
  0x8e   :  { %v47_v50 = vpop.permute.xlu0 %46  ;;  %v1084_v60 = vsel %vm182_vm15, 1.0, %v1261_v30 }
  0x8f   :  { %1209 = vset.pattern.permute.xlu1 %v1259_v3  ;;  %vm85_vm3 = vcmp.eq.s32.totalorder %v47_v50, %v1391_v27 }
  0x90   :  { %64 = vperm.xlu1 %1209, %v27_v41   ;;  %v175_v51 = vpop.permute.xlu1 %174  ;;  %1151 = vmatmul.msk.f32.gmra.mxu2 %vm230_vm0, %v1133_v48  ;;  %v1069_v1 = vsel %vm85_vm3, 1.0, %v1261_v30 }
  0x91   :  { %vm193_vm11 = vcmp.eq.s32.totalorder %v175_v51, %v1391_v27 }
  0x92   :  { %v1095_v52 = vsel %vm193_vm11, 1.0, %v1261_v30  ;;  %1117 = vmatmul.msk.f32.gmra.mxu1 %vm230_vm0, %v1067_v49 }
  0x93   :  { %1113 = vmatmul.msk.f32.gmra.mxu3 %vm230_vm0, %v1095_v52  ;;  %1210 = vset.pattern.permute.xlu2 %v1258_v2 }
  0x94   :  { %162 = vperm.xlu2 %1210, %v27_v41  }
  0x95   :  { %v71_v53 = vpop.permute.xlu2 %70 }
  0x96   :  { %vm93_vm1 = vcmp.eq.s32.totalorder %v71_v53, %v1391_v27 }
  0x97   :  { %v178_v56 = vpop.permute.xlu0 %177  ;;  %v1077_v61 = vsel %vm93_vm1, 1.0, %v1261_v30 }
  0x98   :  { %1212 = vset.pattern.permute.xlu1 %v1260_v5  ;;  %v139_v55 = vpop.permute.xlu1 %138  ;;  %1152 = vmatmul.msk.f32.gmra.mxu2 %vm230_vm0, %v1134_v54  ;;  %vm194_vm14 = vcmp.eq.s32.totalorder %v178_v56, %v1391_v27 }
  0x99   :  { %vm181_vm13 = vcmp.eq.s32.totalorder %v139_v55, %v1391_v27  ;;  %503 = vperm.xlu1 %1212, %v1323_v10   ;;  %v1096_v58 = vsel %vm194_vm14, 1.0, %v1261_v30 }
  0x9a   :  { %v1083_v57 = vsel %vm181_vm13, 1.0, %v1261_v30 }
  0x9b   :  { %1101 = vmatmul.msk.f32.gmra.mxu0 %vm230_vm0, %v1083_v57  ;;  %1114 = vmatmul.msk.f32.gmra.mxu3 %vm230_vm0, %v1096_v58  ;;  %v1550_v57 = vshrl.u32 %v15_v24, 7 }
  0x9c   :  { %1213 = vset.pattern.permute.xlu2 %v1259_v3 }
  0x9d   :  { %67 = vperm.xlu2 %1213, %v1405_v34  }
  0x9e   :  { %v474_v59 = vpop.permute.xlu2 %473 }
  0x9f   :  { %vm510_vm6 = vcmp.eq.s32.totalorder %v474_v59, %v1391_v27  ;;  %v148_v9 = vpop.permute.xlu0 %147 }
  0xa0   :  { %v1136_v6 = vsel %vm510_vm6, 1.0, %v1261_v30  ;;  %vm184_vm8 = vcmp.eq.s32.totalorder %v148_v9, %v1391_v27 }
  0xa1   :  { %1214 = vset.pattern.permute.xlu1 %v1258_v2  ;;  %v44_v62 = vpop.permute.xlu1 %43  ;;  %v1086_v11 = vsel %vm184_vm8, 1.0, %v1261_v30 }
  0xa2   :  { %vm84_vm2 = vcmp.eq.s32.totalorder %v44_v62, %v1391_v27  ;;  %165 = vperm.xlu1 %1214, %v1405_v34   ;;  %v687_v62 = vadd.s32 8, %v1550_v57 }
  0xa3   :  { %v1068_v63 = vsel %vm84_vm2, 1.0, %v1261_v30  ;;  %1102 = vmatmul.msk.f32.gmra.mxu0 %vm230_vm0, %v1084_v60  ;;  %1127 = vmatmul.msk.f32.vlgmr.msrb.gmra.mxu3 %vm230_vm0, %v1077_v61 }
  0xa4   :  { %1118 = vmatmul.msk.f32.gmra.mxu1 %vm230_vm0, %v1068_v63 }
  0xa7   :  { %v50_v0 = vpop.permute.xlu2 %49 }
  0xa8   :  { %vm86_vm5 = vcmp.eq.s32.totalorder %v50_v0, %v1391_v27  ;;  %v480_v19 = vpop.permute.xlu0 %479 }
  0xa9   :  { %v1070_v5 = vsel %vm86_vm5, 1.0, %v1261_v30  ;;  %vm512_vm13 = vcmp.eq.s32.totalorder %v480_v19, %v1391_v27 }
  0xaa   :  { %v471_v3 = vpop.permute.xlu1 %470  ;;  %v1138_v21 = vsel %vm512_vm13, 1.0, %v1261_v30 }
  0xab   :  { %vm509_vm4 = vcmp.eq.s32.totalorder %v471_v3, %v1391_v27 }
  0xac   :  { %v1135_v2 = vsel %vm509_vm4, 1.0, %v1261_v30  ;;  %1119 = vmatmul.msk.f32.gmra.mxu1 %vm230_vm0, %v1069_v1 }
  0xad   :  { %1153 = vmatmul.msk.f32.gmra.mxu2 %vm230_vm0, %v1135_v2  ;;  %v713_v2 = vand.u32 15, %v687_v62 }
  0xaf   :  { %v77_v4 = vpop.permute.xlu2 %76 }
  0xb0   :  { %vm95_vm11 = vcmp.eq.s32.totalorder %v77_v4, %v1391_v27  ;;  %v495_v25 = vpop.permute.xlu0 %494 }
  0xb1   :  { %v1079_v16 = vsel %vm95_vm11, 1.0, %v1261_v30  ;;  %vm517_vm4 = vcmp.eq.s32.totalorder %v495_v25, %v1391_v27 }
  0xb2   :  { %v1143_v36 = vsel %vm517_vm4, 1.0, %v1261_v30 }
  0xb3   :  { %v145_v7 = vpop.permute.xlu1 %144 }
  0xb4   :  { %vm183_vm7 = vcmp.eq.s32.totalorder %v145_v7, %v1391_v27  ;;  %1120 = vmatmul.msk.f32.gmra.mxu1 %vm230_vm0, %v1070_v5 }
  0xb5   :  { %v1085_v8 = vsel %vm183_vm7, 1.0, %v1261_v30  ;;  %1154 = vmatmul.msk.f32.gmra.mxu2 %vm230_vm0, %v1136_v6 }
  0xb6   :  { %1103 = vmatmul.msk.f32.gmra.mxu0 %vm230_vm0, %v1085_v8 }
  0xb8   :  { %v151_v10 = vpop.permute.xlu2 %150  ;;  %v486_v33 = vpop.permute.xlu0 %485 }
  0xb9   :  { %vm185_vm10 = vcmp.eq.s32.totalorder %v151_v10, %v1391_v27  ;;  %vm514_vm3 = vcmp.eq.s32.totalorder %v486_v33, %v1391_v27 }
  0xba   :  { %v1087_v15 = vsel %vm185_vm10, 1.0, %v1261_v30  ;;  %v1140_v34 = vsel %vm514_vm3, 1.0, %v1261_v30  ;;  %vm895_vm3 = vcmp.lt.s32.totalorder %v713_v2, 10 }
  0xbc   :  { %v74_v12 = vpop.permute.xlu1 %73 }
  0xbd   :  { %vm94_vm9 = vcmp.eq.s32.totalorder %v74_v12, %v1391_v27 }
  0xbe   :  { %v1078_v13 = vsel %vm94_vm9, 1.0, %v1261_v30  ;;  %1104 = vmatmul.msk.f32.gmra.mxu0 %vm230_vm0, %v1086_v11 }
  0xbf   :  { %1128 = vmatmul.msk.f32.gmra.mxu3 %vm230_vm0, %v1078_v13 }
  0xc1   :  { %v56_v14 = vpop.permute.xlu2 %55  ;;  %v160_v42 = vpop.permute.xlu0 %159 }
  0xc2   :  { %vm88_vm1 = vcmp.eq.s32.totalorder %v56_v14, %v1391_v27  ;;  %vm188_vm8 = vcmp.eq.s32.totalorder %v160_v42, %v1391_v27 }
  0xc3   :  { %v1072_v31 = vsel %vm88_vm1, 1.0, %v1261_v30  ;;  %v1090_v44 = vsel %vm188_vm8, 1.0, %v1261_v30 }
  0xc5   :  { %v477_v17 = vpop.permute.xlu1 %476 }
  0xc6   :  { %vm511_vm12 = vcmp.eq.s32.totalorder %v477_v17, %v1391_v27  ;;  %1105 = vmatmul.msk.f32.gmra.mxu0 %vm230_vm0, %v1087_v15 }
  0xc7   :  { %v1137_v18 = vsel %vm511_vm12, 1.0, %v1261_v30  ;;  %1129 = vmatmul.msk.f32.gmra.mxu3 %vm230_vm0, %v1079_v16 }
  0xc8   :  { %1155 = vmatmul.msk.f32.gmra.mxu2 %vm230_vm0, %v1137_v18 }
  0xca   :  { %v483_v20 = vpop.permute.xlu2 %482  ;;  %v492_v53 = vpop.permute.xlu0 %491 }
  0xcb   :  { %vm513_vm15 = vcmp.eq.s32.totalorder %v483_v20, %v1391_v27  ;;  %v689_v20 = vadd.s32 24, %v1550_v57 }
  0xcc   :  { %v1139_v28 = vsel %vm513_vm15, 1.0, %v1261_v30 }
  0xce   :  { %v53_v22 = vpop.permute.xlu1 %52 }
  0xcf   :  { %vm87_vm14 = vcmp.eq.s32.totalorder %v53_v22, %v1391_v27  ;;  %v727_v22 = vand.u32 15, %v689_v20 }
  0xd0   :  { %v1071_v23 = vsel %vm87_vm14, 1.0, %v1261_v30  ;;  %1156 = vmatmul.msk.f32.gmra.mxu2 %vm230_vm0, %v1138_v21  ;;  %vm516_vm14 = vcmp.eq.s32.totalorder %v492_v53, %v1391_v27 }
  0xd1   :  { %1121 = vmatmul.msk.f32.gmra.mxu1 %vm230_vm0, %v1071_v23  ;;  %v1142_v58 = vsel %vm516_vm14, 1.0, %v1261_v30  ;;  %vm1033_vm14 = vcmask 1043459  }
  0xd3   :  { %v157_v26 = vpop.permute.xlu2 %156 }
  0xd4   :  { %vm187_vm6 = vcmp.eq.s32.totalorder %v157_v26, %v1391_v27 }
  0xd5   :  { %v1089_v39 = vsel %vm187_vm6, 1.0, %v1261_v30  ;;  %vm1027_vm6 = vcmask 1041409  }
  0xd6   :  { %v80_v29 = vpop.permute.xlu1 %79 }
  0xd7   :  { %vm96_vm2 = vcmp.eq.s32.totalorder %v80_v29, %v1391_v27 }
  0xd8   :  { %v1080_v32 = vsel %vm96_vm2, 1.0, %v1261_v30  ;;  %1157 = vmatmul.msk.f32.gmra.mxu2 %vm230_vm0, %v1139_v28 }
  0xd9   :  { %1130 = vmatmul.msk.f32.gmra.mxu3 %vm230_vm0, %v1080_v32  ;;  %1122 = vmatmul.msk.f32.gmra.mxu1 %vm230_vm0, %v1072_v31 }
  0xdc   :  { %v62_v35 = vpop.permute.xlu2 %61 }
  0xdd   :  { %vm90_vm9 = vcmp.eq.s32.totalorder %v62_v35, %v1391_v27 }
  0xde   :  { %v1074_v45 = vsel %vm90_vm9, 1.0, %v1261_v30 }
  0xdf   :  { %v154_v37 = vpop.permute.xlu1 %153 }
  0xe0   :  { %vm186_vm5 = vcmp.eq.s32.totalorder %v154_v37, %v1391_v27  ;;  %1158 = vmatmul.msk.f32.gmra.mxu2 %vm230_vm0, %v1140_v34 }
  0xe1   :  { %v1088_v38 = vsel %vm186_vm5, 1.0, %v1261_v30  ;;  %1161 = vmatmul.msk.f32.vlgmr.msra.gmra.mxu3 %vm230_vm0, %v1143_v36  ;;  %vm897_vm5 = vcmp.lt.s32.totalorder %v727_v22, 10 }
  0xe2   :  { %1106 = vmatmul.msk.f32.gmra.mxu0 %vm230_vm0, %v1088_v38 }
  0xe5   :  { %v501_v40 = vpop.permute.xlu2 %500 }
  0xe6   :  { %vm519_vm12 = vcmp.eq.s32.totalorder %v501_v40, %v1391_v27 }
  0xe7   :  { %v1145_v50 = vsel %vm519_vm12, 1.0, %v1261_v30 }
  0xe8   :  { %v59_v41 = vpop.permute.xlu1 %58 }
  0xe9   :  { %vm89_vm7 = vcmp.eq.s32.totalorder %v59_v41, %v1391_v27 }
  0xea   :  { %v1073_v43 = vsel %vm89_vm7, 1.0, %v1261_v30  ;;  %1107 = vmatmul.msk.f32.gmra.mxu0 %vm230_vm0, %v1089_v39 }
  0xeb   :  { %1123 = vmatmul.msk.f32.gmra.mxu1 %vm230_vm0, %v1073_v43 }
  0xee   :  { %v163_v47 = vpop.permute.xlu2 %162 }
  0xef   :  { %vm189_vm11 = vcmp.eq.s32.totalorder %v163_v47, %v1391_v27 }
  0xf0   :  { %v1091_v49 = vsel %vm189_vm11, 1.0, %v1261_v30 }
  0xf1   :  { %v498_v46 = vpop.permute.xlu1 %497 }
  0xf2   :  { %vm518_vm10 = vcmp.eq.s32.totalorder %v498_v46, %v1391_v27  ;;  %1108 = vmatmul.msk.f32.gmra.mxu0 %vm230_vm0, %v1090_v44  ;;  %v1575_v44 = vld [vmem:[%s1630_s2] ss:$0 sm:$0xff]  ;;  %s1262_s2 = smov [#allocation2]  }
  0xf3   :  { %v1144_v48 = vsel %vm518_vm10, 1.0, %v1261_v30  ;;  %1124 = vmatmul.msk.f32.gmra.mxu1 %vm230_vm0, %v1074_v45  ;;  %s1054_s29 = sshll.u32 %s1262_s2, 4  ;;  %s1055_s29 = int_to_ptr.vmem [resolvable:$true] %s1054_s29 }
  0xf4   :  { %1162 = vmatmul.msk.f32.gmra.mxu3 %vm230_vm0, %v1144_v48 }
  0xf5   :  { %v409_v54 = vpop.f32.mrf.mxu1 }
  0xf7   :  { %v68_v63 = vpop.permute.xlu2 %67 }
  0xf8   :  { %vm92_vm1 = vcmp.eq.s32.totalorder %v68_v63, %v1391_v27 }
  0xf9   :  { %v489_v51 = vpop.permute.xlu1 %488  ;;  %v1076_v4 = vsel %vm92_vm1, 1.0, %v1261_v30  ;;  %vm1039_vm1 = vcmask 1045509  }
  0xfa   :  { %vm515_vm13 = vcmp.eq.s32.totalorder %v489_v51, %v1391_v27  ;;  %1109 = vmatmul.msk.f32.gmra.mxu0 %vm230_vm0, %v1091_v49  ;;  %v332_v32 = vpop.f32.mrf.mxu3 }
  0xfb   :  { %v1141_v52 = vsel %vm515_vm13, 1.0, %v1261_v30  ;;  %vm1030_vm13 = vcmask 1042434  }
  0xfc   :  { %1159 = vmatmul.msk.f32.gmra.mxu2 %vm230_vm0, %v1141_v52  ;;  %1163 = vmatmul.msk.f32.gmra.mxu3 %vm230_vm0, %v1145_v50 }
  0xfe   :  { %v296_v55 = vpop.f32.mrf.mxu0 }
  0xff   :  { %v410_v56 = vadd.f32 %v409_v54, %v296_v55 }
 0x102   :  { %v65_v59 = vpop.permute.xlu1 %64  ;;  %v335_v42 = vpop.f32.mrf.mxu3 }
 0x103   :  { %vm91_vm15 = vcmp.eq.s32.totalorder %v65_v59, %v1391_v27  ;;  %v621_v61 = vpop.f32.mrf.mxu2 }
 0x104   :  { %v1075_v60 = vsel %vm91_vm15, 1.0, %v1261_v30  ;;  %1160 = vmatmul.msk.f32.gmra.mxu2 %vm230_vm0, %v1142_v58  ;;  %v669_v0 = vadd.f32 %v621_v61, %v410_v56  ;;  %vm1036_vm15 = vcmask 1044484  }
 0x105   :  { %1125 = vmatmul.msk.f32.gmra.mxu1 %vm230_vm0, %v1075_v60 }
 0x106   :  { %v299_v1 = vpop.f32.mrf.mxu0  ;;  %v926_v10 = vsel %vm230_vm0, %v669_v0, -inf }
 0x107   :  { %v412_v3 = vpop.f32.mrf.mxu1 }
 0x108   :  { %v413_v24 = vadd.f32 %v412_v3, %v299_v1 }
 0x10b   :  { %v504_v5 = vpop.permute.xlu1 %503  ;;  %v624_v6 = vpop.f32.mrf.mxu2 }
 0x10c   :  { %vm520_vm2 = vcmp.eq.s32.totalorder %v504_v5, %v1391_v27  ;;  %v670_v8 = vadd.f32 %v624_v6, %v413_v24 }
 0x10d   :  { %v1146_v7 = vsel %vm520_vm2, 1.0, %v1261_v30  ;;  %1126 = vmatmul.msk.f32.gmra.mxu1 %vm230_vm0, %v1076_v4  ;;  %vm1042_vm2 = vcmask 1046534  }
 0x10e   :  { %1164 = vmatmul.msk.f32.gmra.mxu3 %vm230_vm0, %v1146_v7  ;;  %v911_v9 = vsel %vm895_vm3, %v670_v8, -inf  ;;  %vm1045_vm3 = vcmask 1047559  }
 0x10f   :  { %v927_v11 = vsel %vm230_vm0, %v911_v9, -inf  ;;  %v415_v15 = vpop.f32.mrf.mxu1 }
 0x110   :  { %v928_v12 = vmax.f32 %v926_v10, %v927_v11  ;;  %v699_v11 = vadd.s32 104, %v1550_v57 }
 0x112   :  { %v929_v21 = vrot.slane %v928_v12, 4 }
 0x113   :  { %v627_v16 = vpop.f32.mrf.mxu2 }
 0x114   :  { %v166_v13 = vpop.permute.xlu1 %165  ;;  %v930_v28 = vmax.f32 %v928_v12, %v929_v21  ;;  %v691_v12 = vadd.s32 40, %v1550_v57 }
 0x115   :  { %vm190_vm4 = vcmp.eq.s32.totalorder %v166_v13, %v1391_v27  ;;  %v693_v13 = vadd.s32 56, %v1550_v57 }
 0x116   :  { %v1092_v14 = vsel %vm190_vm4, 1.0, %v1261_v30  ;;  %v931_v31 = vrot.slane %v930_v28, 2  ;;  %v1579_v49 = vpop.f32.mrf.mxu3 }
 0x117   :  { %1110 = vmatmul.msk.f32.gmra.mxu0 %vm230_vm0, %v1092_v14  ;;  %v797_v14 = vand.u32 15, %v699_v11 }
 0x118   :  { %v302_v17 = vpop.f32.mrf.mxu0  ;;  %v932_v36 = vmax.f32 %v930_v28, %v931_v31 }
 0x119   :  { %v416_v18 = vadd.f32 %v415_v15, %v302_v17  ;;  %vm907_vm7 = vcmp.lt.s32.totalorder %v797_v14, 10 }
 0x11a   :  { %v933_v39 = vrot.slane %v932_v36, 1 }
 0x11b   :  { %v671_v19 = vadd.f32 %v627_v16, %v416_v18  ;;  %v630_v26 = vpop.f32.mrf.mxu2  ;;  %v741_v16 = vand.u32 15, %v691_v12  ;;  %v697_v12 = vadd.s32 88, %v1550_v57 }
 0x11c   :  { %v934_v43 = vmax.f32 %v932_v36, %v933_v39 }
 0x11d   :  { %v935_v33 = vsel %vm230_vm0, %v671_v19, -inf  ;;  %v695_v19 = vadd.s32 72, %v1550_v57  ;;  %vm1593_vm8 = vcmp.lt.s32.totalorder %v741_v16, 10 }
 0x11e   :  { %v1002_v47 = vadd.f32 %v1575_v44, %v934_v43  ;;  %v1581_v53 = vpop.f32.mrf.mxu3 }
 0x120   :  { %v305_v23 = vpop.f32.mrf.mxu0 }
 0x121   :  { %v418_v25 = vpop.f32.mrf.mxu1 }
 0x122   :  { %v419_v29 = vadd.f32 %v418_v25, %v305_v23  ;;  %v755_v23 = vand.u32 15, %v693_v13 }
 0x124   :  { %v672_v27 = vadd.f32 %v630_v26, %v419_v29  ;;  %vm901_vm9 = vcmp.lt.s32.totalorder %v755_v23, 10 }
 0x126   :  { %v913_v30 = vsel %vm897_vm5, %v672_v27, -inf  ;;  %v445_v58 = vpop.f32.mrf.mxu3 }
 0x127   :  { %v936_v34 = vsel %vm230_vm0, %v913_v30, -inf  ;;  %v446_v15 = vadd.f32 %v445_v58, %v332_v32  ;;  %v769_v30 = vand.u32 15, %v695_v19 }
 0x128   :  { %v937_v35 = vmax.f32 %v935_v33, %v936_v34 }
 0x129   :  { %v421_v56 = vpop.f32.mrf.mxu1  ;;  %vm903_vm10 = vcmp.lt.s32.totalorder %v769_v30, 10 }
 0x12a   :  { %v938_v37 = vrot.slane %v937_v35, 4 }
 0x12c   :  { %v939_v38 = vmax.f32 %v937_v35, %v938_v37 }
 0x12e   :  { %v940_v40 = vrot.slane %v939_v38, 2 }
 0x130   :  { %v941_v41 = vmax.f32 %v939_v38, %v940_v40  ;;  %v633_v59 = vpop.f32.mrf.mxu2 }
 0x131   :  { %v424_v61 = vpop.f32.mrf.mxu1 }
 0x132   :  { %v942_v45 = vrot.slane %v941_v41, 1 }
 0x133   :  { %v308_v55 = vpop.f32.mrf.mxu0 }
 0x134   :  { %v943_v46 = vmax.f32 %v941_v41, %v942_v45  ;;  %v422_v32 = vadd.f32 %v421_v56, %v308_v55 }
 0x136   :  { %v1003_v48 = vadd.f32 %v1575_v44, %v943_v46  ;;  %v673_v45 = vadd.f32 %v633_v59, %v422_v32 }
 0x138   :  { %1216 = vtanh.f32 %v1003_v48  ;;  %v636_v63 = vpop.f32.mrf.mxu2 }
 0x139   :  { %1218 = vtanh.f32 %v1002_v47 }
 0x13b   :  { %v311_v60 = vpop.f32.mrf.mxu0 }
 0x13c   :  { %v425_v20 = vadd.f32 %v424_v61, %v311_v60 }
 0x13e   :  { %v1217_v50 = vpop.eup %1216  ;;  %v674_v33 = vadd.f32 %v636_v63, %v425_v20 }
 0x13f   :  { %v1026_v51 = vrot.slane %v1217_v50, 7  ;;  %v1219_v52 = vpop.eup %1218 }
 0x141   :  { %v1583_v54 = vsel %vm1027_vm6, %v1026_v51, %v1219_v52  ;;  %v944_v52 = vsel %vm230_vm0, %v673_v45, -inf }
 0x142   :  { %v448_v62 = vpop.f32.mrf.mxu3 }
 0x143   :  { %v314_v0 = vpop.f32.mrf.mxu0  ;;  %v449_v21 = vadd.f32 %v448_v62, %v335_v42  ;;  %v915_v42 = vsel %vm1593_vm8, %v674_v33, -inf }
 0x144   :  { %v945_v48 = vsel %vm230_vm0, %v915_v42, -inf }
 0x145   :  { %v946_v58 = vmax.f32 %v944_v52, %v945_v48 }
 0x147   :  { %v947_v63 = vrot.slane %v946_v58, 4 }
 0x14a   :  { %v1585_v3 = vpop.f32.mrf.mxu3 }
 0x14b   :  { %v639_v24 = vpop.f32.mrf.mxu2  ;;  %v452_v13 = vadd.f32 %v1585_v3, %v1579_v49 }
 0x14e   :  { %v427_v1 = vpop.f32.mrf.mxu1 }
 0x14f   :  { %v428_v36 = vadd.f32 %v427_v1, %v314_v0  ;;  %v701_v1 = vadd.s32 120, %v1550_v57 }
 0x151   :  { %v675_v46 = vadd.f32 %v639_v24, %v428_v36 }
 0x153   :  { %v642_v6 = vpop.f32.mrf.mxu2  ;;  %v953_v55 = vsel %vm230_vm0, %v675_v46, -inf }
 0x156   :  { %v430_v4 = vpop.f32.mrf.mxu1 }
 0x15b   :  { %v645_v10 = vpop.f32.mrf.mxu2 }
 0x15c   :  { %v1587_v5 = vpop.f32.mrf.mxu3 }
 0x15f   :  { %v317_v2 = vpop.f32.mrf.mxu0 }
 0x160   :  { %v431_v22 = vadd.f32 %v430_v4, %v317_v2  ;;  %v948_v4 = vmax.f32 %v946_v58, %v947_v63 }
 0x162   :  { %v676_v34 = vadd.f32 %v642_v6, %v431_v22  ;;  %v949_v14 = vrot.slane %v948_v4, 2 }
 0x163   :  { %v648_v31 = vpop.f32.mrf.mxu2 }
 0x164   :  { %v657_v9 = vpop.f32.mrf.mxu3  ;;  %v917_v43 = vsel %vm901_vm9, %v676_v34, -inf }
 0x165   :  { %v681_v25 = vadd.f32 %v657_v9, %v446_v15  ;;  %v954_v50 = vsel %vm230_vm0, %v917_v43, -inf  ;;  %v455_v15 = vadd.f32 %v1587_v5, %v1581_v53 }
 0x166   :  { %v955_v60 = vmax.f32 %v953_v55, %v954_v50 }
 0x167   :  { %v320_v7 = vpop.f32.mrf.mxu0  ;;  %v980_v37 = vsel %vm230_vm0, %v681_v25, -inf  ;;  %v783_v25 = vand.u32 15, %v697_v12 }
 0x168   :  { %v433_v8 = vpop.f32.mrf.mxu1  ;;  %v956_v59 = vrot.slane %v955_v60, 4 }
 0x169   :  { %v434_v41 = vadd.f32 %v433_v8, %v320_v7  ;;  %vm905_vm12 = vcmp.lt.s32.totalorder %v783_v25, 10 }
 0x16a   :  { %v957_v6 = vmax.f32 %v955_v60, %v956_v59 }
 0x16b   :  { %v677_v51 = vadd.f32 %v645_v10, %v434_v41  ;;  %v811_v10 = vand.u32 15, %v701_v1 }
 0x16c   :  { %v958_v16 = vrot.slane %v957_v6, 2 }
 0x16d   :  { %v962_v61 = vsel %vm230_vm0, %v677_v51, -inf  ;;  %vm909_vm11 = vcmp.lt.s32.totalorder %v811_v10, 10 }
 0x16f   :  { %v323_v17 = vpop.f32.mrf.mxu0 }
 0x170   :  { %v436_v18 = vpop.f32.mrf.mxu1 }
 0x171   :  { %v437_v28 = vadd.f32 %v436_v18, %v323_v17 }
 0x173   :  { %v678_v39 = vadd.f32 %v648_v31, %v437_v28  ;;  %v959_v28 = vmax.f32 %v957_v6, %v958_v16 }
 0x175   :  { %v919_v47 = vsel %vm903_vm10, %v678_v39, -inf  ;;  %v960_v36 = vrot.slane %v959_v28, 1 }
 0x176   :  { %v963_v56 = vsel %vm230_vm0, %v919_v47, -inf }
 0x177   :  { %v660_v26 = vpop.f32.mrf.mxu3  ;;  %v964_v62 = vmax.f32 %v962_v61, %v963_v56  ;;  %v326_v8 = vpop.f32.mrf.mxu0  ;;  %v961_v47 = vmax.f32 %v959_v28, %v960_v36 }
 0x178   :  { %v682_v29 = vadd.f32 %v660_v26, %v449_v21  ;;  %v950_v26 = vmax.f32 %v948_v4, %v949_v14 }
 0x179   :  { %v965_v24 = vrot.slane %v964_v62, 4  ;;  %v1005_v60 = vadd.f32 %v1575_v44, %v961_v47 }
 0x17a   :  { %v923_v35 = vsel %vm907_vm7, %v682_v29, -inf  ;;  %v951_v34 = vrot.slane %v950_v26, 1 }
 0x17b   :  { %v981_v38 = vsel %vm230_vm0, %v923_v35, -inf  ;;  %v966_v11 = vmax.f32 %v964_v62, %v965_v24 }
 0x17c   :  { %v982_v40 = vmax.f32 %v980_v37, %v981_v38  ;;  %v952_v45 = vmax.f32 %v950_v26, %v951_v34 }
 0x17d   :  { %v967_v20 = vrot.slane %v966_v11, 2 }
 0x17e   :  { %v983_v9 = vrot.slane %v982_v40, 4  ;;  %v1004_v56 = vadd.f32 %v1575_v44, %v952_v45 }
 0x17f   :  { %v663_v0 = vpop.f32.mrf.mxu3  ;;  %v651_v7 = vpop.f32.mrf.mxu2  ;;  %v968_v31 = vmax.f32 %v966_v11, %v967_v20 }
 0x180   :  { %v984_v17 = vmax.f32 %v982_v40, %v983_v9  ;;  %v683_v18 = vadd.f32 %v663_v0, %v452_v13  ;;  %1220 = vtanh.f32 %v1004_v56 }
 0x181   :  { %v969_v39 = vrot.slane %v968_v31, 1  ;;  %1222 = vtanh.f32 %v1005_v60 }
 0x182   :  { %v439_v2 = vpop.f32.mrf.mxu1  ;;  %v985_v49 = vrot.slane %v984_v17, 2  ;;  %v989_v3 = vsel %vm230_vm0, %v683_v18, -inf }
 0x183   :  { %v440_v21 = vadd.f32 %v439_v2, %v326_v8  ;;  %v970_v51 = vmax.f32 %v968_v31, %v969_v39 }
 0x184   :  { %v986_v37 = vmax.f32 %v984_v17, %v985_v49 }
 0x185   :  { %v679_v30 = vadd.f32 %v651_v7, %v440_v21  ;;  %v1006_v63 = vadd.f32 %v1575_v44, %v970_v51 }
 0x186   :  { %v987_v48 = vrot.slane %v986_v37, 1  ;;  %v1221_v7 = vpop.eup %1220 }
 0x187   :  { %v654_v27 = vpop.f32.mrf.mxu2  ;;  %v971_v40 = vsel %vm230_vm0, %v679_v30, -inf  ;;  %1224 = vtanh.f32 %v1006_v63  ;;  %v1223_v8 = vpop.eup %1222  ;;  %v1029_v10 = vrot.slane %v1221_v7, 6 }
 0x188   :  { %v988_v61 = vmax.f32 %v986_v37, %v987_v48  ;;  %v1032_v11 = vrot.slane %v1223_v8, 5 }
 0x189   :  { %v1031_v16 = vsel %vm1030_vm13, %v1029_v10, %v1583_v54 }
 0x18a   :  { %v442_v23 = vpop.f32.mrf.mxu1  ;;  %v1008_v1 = vadd.f32 %v1575_v44, %v988_v61  ;;  %v1034_v17 = vsel %vm1033_vm14, %v1032_v11, %v1031_v16 }
 0x18c   :  { %1226 = vtanh.f32 %v1008_v1 }
 0x18d   :  { %v1225_v9 = vpop.eup %1224 }
 0x18e   :  { %v1035_v13 = vrot.slane %v1225_v9, 4 }
 0x190   :  { %v1037_v18 = vsel %vm1036_vm15, %v1035_v13, %v1034_v17 }
 0x191   :  { %v666_v19 = vpop.f32.mrf.mxu3 }
 0x192   :  { %v684_v22 = vadd.f32 %v666_v19, %v455_v15  ;;  %v1227_v12 = vpop.eup %1226 }
 0x193   :  { %v1041_v19 = vrot.slane %v1227_v12, 2 }
 0x194   :  { %v925_v57 = vsel %vm909_vm11, %v684_v22, -inf  ;;  %v329_v29 = vpop.f32.mrf.mxu0 }
 0x195   :  { %v990_v53 = vsel %vm230_vm0, %v925_v57, -inf  ;;  %v443_v5 = vadd.f32 %v442_v23, %v329_v29 }
 0x196   :  { %v991_v32 = vmax.f32 %v989_v3, %v990_v53 }
 0x197   :  { %v680_v33 = vadd.f32 %v654_v27, %v443_v5 }
 0x198   :  { %v992_v35 = vrot.slane %v991_v32, 4 }
 0x199   :  { %v921_v38 = vsel %vm905_vm12, %v680_v33, -inf }
 0x19a   :  { %v993_v41 = vmax.f32 %v991_v32, %v992_v35  ;;  %v972_v42 = vsel %vm230_vm0, %v921_v38, -inf }
 0x19b   :  { %v973_v43 = vmax.f32 %v971_v40, %v972_v42 }
 0x19c   :  { %v994_v46 = vrot.slane %v993_v41, 2 }
 0x19d   :  { %v974_v50 = vrot.slane %v973_v43, 4 }
 0x19e   :  { %v995_v52 = vmax.f32 %v993_v41, %v994_v46 }
 0x19f   :  { %v975_v55 = vmax.f32 %v973_v43, %v974_v50 }
 0x1a0   :  { %v996_v58 = vrot.slane %v995_v52, 1 }
 0x1a1   :  { %v976_v62 = vrot.slane %v975_v55, 2 }
 0x1a2   :  { %v997_v59 = vmax.f32 %v995_v52, %v996_v58 }
 0x1a3   :  { %v977_v0 = vmax.f32 %v975_v55, %v976_v62 }
 0x1a4   :  { %v1009_v2 = vadd.f32 %v1575_v44, %v997_v59 }
 0x1a5   :  { %v978_v24 = vrot.slane %v977_v0, 1 }
 0x1a6   :  { %1228 = vtanh.f32 %v1009_v2 }
 0x1a7   :  { %v979_v4 = vmax.f32 %v977_v0, %v978_v24 }
 0x1a9   :  { %v1007_v6 = vadd.f32 %v1575_v44, %v979_v4 }
 0x1ab   :  { %1230 = vtanh.f32 %v1007_v6 }
 0x1ac   :  { %v1229_v14 = vpop.eup %1228 }
 0x1ad   :  { %v1044_v21 = vrot.slane %v1229_v14, 1 }
 0x1b1   :  { %v1231_v15 = vpop.eup %1230 }
 0x1b2   :  { %v1038_v44 = vrot.slane %v1231_v15, 3 }
 0x1b4   :  { %v1040_v20 = vsel %vm1039_vm1, %v1038_v44, %v1037_v18 }
 0x1b5   :  { %v1043_v22 = vsel %vm1042_vm2, %v1041_v19, %v1040_v20 }
 0x1b6   :  { %v1046_v23 = vsel %vm1045_vm3, %v1044_v21, %v1043_v22 }
 0x1b7   :  { %1048 = vst.msk [vmem:[#allocation2] sm:$0xff] %vm230_vm0, %v1046_v23 }
 0x1b8   :  { %1059 = dma.vmem_to_hbm [thread:$0]  %s1055_s29, 128, %s1057_s5, [#allocation3]  }
 0x1b9   :  { %1256 = dma.done.wait [#allocation3], 128  }
 0x1ba   :  { %1257 = vsyncadd [#allocation3], 4294967168 }
 0x1bb   :  { %1064 = vsyncpa [#allocation3], 1 }

</bundles_post_ra>
